<compile_context>
chip_gen: v7x
topology: tpu7x:2x2x1
jax: 0.10.0
libtpu: 0.0.40
codegen_flags: <defaults>
</compile_context>

<pallas_src>
import jax
import jax.numpy as jnp
from jax.experimental import pallas as pl
from jax.experimental.pallas import tpu as pltpu


def _round_up(x, m):
    return ((x + m - 1) // m) * m


def _vmem_capacity_bytes():
    try:
        return int(pltpu.get_tpu_info().vmem_capacity_bytes)
    except Exception:
        return 64 * 1024 * 1024  # conservative (v7x physical VMEM per core)


def _tensorcores_per_chip():
    try:
        dev = jax.devices()[0]
        if dev.platform != "tpu":
            return 1
        kind = str(getattr(dev, "device_kind", "")).lower()
        if "v7" in kind:
            return 2
    except Exception:
        pass
    return 1


def _resident_spec(shape):
    """BlockSpec for a block that never changes across the grid (single-buffered)."""
    index_map = lambda *args: tuple(0 for _ in shape)
    try:
        return pl.BlockSpec(shape, index_map, pipeline_mode=pl.Buffered(1))
    except TypeError:  # older API without pipeline_mode
        return pl.BlockSpec(shape, index_map)


def _context_gating_kernel(x_ref, w_ref, b_ref, o_ref):
    """Fused out = x * sigmoid(x @ w + b) for one (Bt, D) x (D, Dn) tile."""
    x = x_ref[...]                                   # (Bt, D), input dtype
    w = w_ref[...]                                   # (D, Dn), mxu dtype
    xm = x.astype(w.dtype) if x.dtype != w.dtype else x
    y = jnp.dot(xm, w, preferred_element_type=jnp.float32)   # MXU, f32 accum
    y = y + b_ref[...].astype(jnp.float32)                   # (1, Dn) broadcast
    gate = jax.nn.sigmoid(y)                                  # EUP, f32
    # Keep the final multiply in x's dtype (bf16 VPU on v6e/v7x); no f32 temp.
    o_ref[...] = (x[:, : gate.shape[1]] if False else x)  # (no-op; clarity)
    o_ref[...] = (x[:, :] * gate.astype(x.dtype)).astype(o_ref.dtype) \
        if gate.shape == x.shape else _gate_mul(x, gate, o_ref)


def _gate_mul(x, gate, o_ref):
    # Column-split case: x is (Bt, D) but this program only produces (Bt, Dn).
    # x columns map 1:1 onto output columns only when Dn == D; when split, the
    # gate columns correspond to output columns j*Dn:(j+1)*Dn of the SAME rows,
    # and the multiply needs the matching x columns.
    raise NotImplementedError  # replaced below; see _context_gating_kernel_split


# The column-split kernel takes the matching x column block explicitly so the
# elementwise multiply lines up with the output tile.
def _context_gating_kernel_split(xk_ref, xg_ref, w_ref, b_ref, o_ref):
    """xk: (Bt, D) rows for the matmul; xg: (Bt, Dn) matching gate columns."""
    xk = xk_ref[...]
    w = w_ref[...]
    xkm = xk.astype(w.dtype) if xk.dtype != w.dtype else xk
    y = jnp.dot(xkm, w, preferred_element_type=jnp.float32)
    y = y + b_ref[...].astype(jnp.float32)
    gate = jax.nn.sigmoid(y)
    xg = xg_ref[...]
    o_ref[...] = (xg * gate.astype(xg.dtype)).astype(o_ref.dtype)


def _context_gating_kernel_full(x_ref, w_ref, b_ref, o_ref):
    """Non-split case: output tile covers all D columns."""
    x = x_ref[...]
    w = w_ref[...]
    xm = x.astype(w.dtype) if x.dtype != w.dtype else x
    y = jnp.dot(xm, w, preferred_element_type=jnp.float32)
    y = y + b_ref[...].astype(jnp.float32)
    gate = jax.nn.sigmoid(y)
    o_ref[...] = (x * gate.astype(x.dtype)).astype(o_ref.dtype)


def context_gating(x, w, b, *, block_rows=512, mxu_dtype=jnp.bfloat16,
                   num_col_blocks=None):
    """Context_Gating forward: out = x * sigmoid(x @ w + b).

    Args:
      x: (B, D) input.
      w: (D, D) Linear weight in (in_dim, out_dim) layout (= torch weight .T).
      b: (D,) or (1, D) Linear bias.
      block_rows: max rows per grid step (multiple of 8).
      mxu_dtype: dtype for the MXU matmul operands (None = keep x's dtype).
      num_col_blocks: force a column split count (None = auto by device).
    """
    B, D = x.shape
    assert w.shape == (D, D), "w must be (in_dim, out_dim) = torch_weight.T"
    b = jnp.reshape(b, (1, D)).astype(jnp.float32)
    w_k = w.astype(mxu_dtype) if mxu_dtype is not None else w

    x_item = jnp.dtype(x.dtype).itemsize
    w_item = jnp.dtype(w_k.dtype).itemsize

    # --- Row tile: multiple of 8, as fat as VMEM allows (big tiles amortize
    # the ~0.35us/step overhead; x/out blocks are double-buffered). ----------
    phys_vmem = _vmem_capacity_bytes()
    budget = int(phys_vmem * 0.45)
    Bt = min(block_rows, _round_up(B, 8))
    Bt = max(8, (Bt // 8) * 8)
    w_resident = D * D * w_item + D * 4
    while Bt > 8 and (w_resident + 4 * Bt * D * x_item) > budget:
        Bt = max(8, Bt // 2)
    row_grid = pl.cdiv(B, Bt)

    # --- Column split: only when one row step would leave a second TC idle. --
    if num_col_blocks is None:
        ncores = _tensorcores_per_chip()
        ncols = ncores if (row_grid == 1 and ncores > 1
                           and D % (128 * ncores) == 0) else 1
    else:
        ncols = max(1, num_col_blocks)
        assert D % (128 * ncols) == 0
    Dn = D // ncols

    # --- VMEM limit: what we need (with headroom), capped below physical. ----
    needed = (D * Dn * w_item * (1 if ncols == 1 else 2)
              + Dn * 4 * (1 if ncols == 1 else 2)
              + 2 * Bt * D * x_item            # x block, double-buffered
              + 2 * Bt * Dn * x_item)          # out block, double-buffered
    vmem_limit = int(min(max(2 * needed + (4 << 20), 32 << 20),
                         int(phys_vmem * 0.9)))

    cost = pl.CostEstimate(
        flops=2 * B * D * D,
        transcendentals=B * D,
        bytes_accessed=(B * D * x_item + D * D * w_item + D * 4
                        + B * D * x_item),
    )
    out_shape = jax.ShapeDtypeStruct((B, D), x.dtype)

    if ncols == 1:
        grid = (row_grid,)
        grid_spec = pltpu.PrefetchScalarGridSpec(
            num_scalar_prefetch=0,
            grid=grid,
            in_specs=[
                pl.BlockSpec((Bt, D), lambda i: (i, 0)),   # x rows (streamed)
                _resident_spec((D, D)),                    # weight, single-buffered
                _resident_spec((1, D)),                    # bias, single-buffered
            ],
            out_specs=pl.BlockSpec((Bt, D), lambda i: (i, 0)),
        )
        return pl.pallas_call(
            _context_gating_kernel_full,
            out_shape=out_shape,
            grid_spec=grid_spec,
            compiler_params=pltpu.CompilerParams(
                dimension_semantics=("parallel",),
                vmem_limit_bytes=vmem_limit),
            cost_estimate=cost,
        )(x, w_k, b)

    # Column-split path (2 TC chips, single row block): both axes parallel.
    grid = (row_grid, ncols)
    grid_spec = pltpu.PrefetchScalarGridSpec(
        num_scalar_prefetch=0,
        grid=grid,
        in_specs=[
            pl.BlockSpec((Bt, D), lambda i, j: (i, 0)),    # x (all cols, for matmul)
            pl.BlockSpec((Bt, Dn), lambda i, j: (i, j)),   # x columns matching out tile
            pl.BlockSpec((D, Dn), lambda i, j: (0, j)),    # weight column block
            pl.BlockSpec((1, Dn), lambda i, j: (0, j)),    # bias column block
        ],
        out_specs=pl.BlockSpec((Bt, Dn), lambda i, j: (i, j)),
    )
    return pl.pallas_call(
        _context_gating_kernel_split,
        out_shape=out_shape,
        grid_spec=grid_spec,
        compiler_params=pltpu.CompilerParams(
            dimension_semantics=("parallel", "parallel"),
            vmem_limit_bytes=vmem_limit),
        cost_estimate=cost,
    )(x, x, w_k, b)


def _ref_context_gating(x, w, b):
    """Pure-JAX reference mirroring torch: fc -> cat -> glu."""
    x1 = x @ w + jnp.reshape(b, (1, -1))
    cat = jnp.concatenate([x, x1], axis=1)
    a, g = jnp.split(cat, 2, axis=1)
    return a * jax.nn.sigmoid(g)


if __name__ == "__main__":
    # Small but lane-dense shapes: batch=16, dimension=256 (multiple of 128).
    B, D = 16, 256
    key = jax.random.PRNGKey(0)
    kx, kw, kb = jax.random.split(key, 3)

    x = jax.random.normal(kx, (B, D), jnp.float32)
    # Weight stored pre-transposed ((in, out) = torch weight .T).
    w = 0.05 * jax.random.normal(kw, (D, D), jnp.float32)
    b = 0.01 * jax.random.normal(kb, (1, D), jnp.float32)

    ref = _ref_context_gating(x, w, b)

    # Exact f32-MXU path: tight tolerance.
    out_f32 = jax.block_until_ready(context_gating(x, w, b, mxu_dtype=None))
    assert out_f32.shape == (B, D)
    assert jnp.allclose(out_f32, ref, atol=1e-5, rtol=1e-5), "f32 path mismatch"

    # Default bf16-MXU path (f32 accumulation): relaxed tolerance.
    out_bf = jax.block_until_ready(context_gating(x, w, b))
    assert out_bf.shape == (B, D)
    assert jnp.allclose(out_bf, ref, atol=3e-2, rtol=3e-2), "bf16 path mismatch"

    # Ragged batch (B not a multiple of the row tile): exercises the masked
    # tail block with no wrapper-side pad/slice copies.
    x2 = jax.random.normal(jax.random.PRNGKey(1), (10, D), jnp.float32)
    out2 = jax.block_until_ready(
        context_gating(x2, w, b, block_rows=8, mxu_dtype=None))
    assert jnp.allclose(out2, _ref_context_gating(x2, w, b),
                        atol=1e-5, rtol=1e-5), "ragged batch mismatch"

    print("KERNEL_OK")
</pallas_src>

<mosaic_0001>
module attributes {stable_mosaic.version = 11 : i64} {
  func.func @_context_gating_kernel_full(%arg0: i32, %arg1: memref<16x256xf32, #tpu.memory_space<vmem>>, %arg2: memref<256x256xf32, #tpu.memory_space<vmem>>, %arg3: memref<1x256xf32, #tpu.memory_space<vmem>>, %arg4: memref<16x256xf32, #tpu.memory_space<vmem>>) attributes {dimension_semantics = [#tpu.dimension_semantics<parallel>], iteration_bounds = array<i64: 1>, scalar_prefetch = 0 : i64, scratch_operands = 0 : i64, tpu.core_type = #tpu.core_type<tc>, window_params = [{transform_indices = @transform_0, window_bounds = array<i64: 16, 256>}, {pipeline_mode = #tpu.pipeline_mode<synchronous>, transform_indices = @transform_1, window_bounds = array<i64: 256, 256>}, {pipeline_mode = #tpu.pipeline_mode<synchronous>, transform_indices = @transform_2, window_bounds = array<i64: 1, 256>}, {transform_indices = @transform_3, window_bounds = array<i64: 16, 256>}]} {
    %c0 = arith.constant 0 : index
    %c0_0 = arith.constant 0 : index
    %0 = vector.load %arg1[%c0, %c0_0] : memref<16x256xf32, #tpu.memory_space<vmem>>, vector<16x256xf32>
    %c0_1 = arith.constant 0 : index
    %c0_2 = arith.constant 0 : index
    %1 = vector.load %arg2[%c0_1, %c0_2] : memref<256x256xf32, #tpu.memory_space<vmem>>, vector<256x256xf32>
    %cst = arith.constant dense<0.000000e+00> : vector<16x256xf32>
    %2 = tpu.matmul %0, %1, %cst {dimension_numbers = #tpu.dot_dimension_numbers<[1], [0], [0], [1], [0, 0, 1, 1], [], []>} : vector<16x256xf32>, vector<256x256xf32>, vector<16x256xf32> -> vector<16x256xf32>
    %c0_3 = arith.constant 0 : index
    %c0_4 = arith.constant 0 : index
    %3 = vector.load %arg3[%c0_3, %c0_4] : memref<1x256xf32, #tpu.memory_space<vmem>>, vector<1x256xf32>
    %4 = vector.broadcast %3 : vector<1x256xf32> to vector<16x256xf32>
    %5 = arith.addf %2, %4 : vector<16x256xf32>
    %6 = arith.negf %5 : vector<16x256xf32>
    %7 = math.exp %6 : vector<16x256xf32>
    %cst_5 = arith.constant 1.000000e+00 : f32
    %8 = vector.broadcast %cst_5 : f32 to vector<16x256xf32>
    %9 = arith.addf %8, %7 : vector<16x256xf32>
    %10 = arith.divf %8, %9 : vector<16x256xf32>
    %11 = arith.mulf %0, %10 : vector<16x256xf32>
    %c0_6 = arith.constant 0 : index
    %c0_7 = arith.constant 0 : index
    %12 = vector.load %arg4[%c0_6, %c0_7] : memref<16x256xf32, #tpu.memory_space<vmem>>, vector<16x256xf32>
    tpu.vector_store %arg4[%c0_6, %c0_7], %11 {strides = array<i32>} : memref<16x256xf32, #tpu.memory_space<vmem>>, vector<16x256xf32>,
    return
  }
  func.func @transform_0(%arg0: i32) -> (i32, i32) {
    %c0_i32 = arith.constant 0 : i32
    %c0_i32_0 = arith.constant 0 : i32
    return %arg0, %c0_i32 : i32, i32
  }
  func.func @transform_1(%arg0: i32) -> (i32, i32) {
    %c0_i32 = arith.constant 0 : i32
    %c0_i32_0 = arith.constant 0 : i32
    %c0_i32_1 = arith.constant 0 : i32
    return %c0_i32, %c0_i32_0 : i32, i32
  }
  func.func @transform_2(%arg0: i32) -> (i32, i32) {
    %c0_i32 = arith.constant 0 : i32
    %c0_i32_0 = arith.constant 0 : i32
    %c0_i32_1 = arith.constant 0 : i32
    return %c0_i32, %c0_i32_0 : i32, i32
  }
  func.func @transform_3(%arg0: i32) -> (i32, i32) {
    %c0_i32 = arith.constant 0 : i32
    %c0_i32_0 = arith.constant 0 : i32
    return %arg0, %c0_i32 : i32, i32
  }
}

</mosaic_0001>

<bundles_post_ra>
// kernel: tpu_custom_call.1
= control target key start
LH: loop header
LB: loop body
LE: loop exit
PB: predicated region body
PF: predicated region fallthrough
CT: control target
= control target key end

     0   :  { %8 = vsyncpa [#allocation3], 0  ;;  %s524_s0 = inlined_call_operand.hbm [shape: f32[16,256], index: 0, kind: input, shape index: {}]   ;;  %s525_s1 = inlined_call_operand.hbm [shape: f32[256,256], index: 1, kind: input, shape index: {}]   ;;  %s526_s2 = inlined_call_operand.vmem [shape: f32[1,256], index: 2, kind: input, shape index: {}]   ;;  %s527_s3 = inlined_call_operand.hbm [shape: f32[16,256], index: 3, kind: output, shape index: {}]  }
   0x1   :  { %9 = vsyncpa [#allocation6], 0 }
   0x2   :  { %10 = vsyncpa [#allocation4], 0  ;;  %s443_s12 = smov [#allocation2]   ;;  %s371_s16 = scalar_lea.hbm %s524_s0, 512 }
   0x3   :  { %s16_s13 = sshll.u32 %s443_s12, 4  ;;  %p372_p0 = scmp.ne.s32.totalorder %s524_s0, %s371_s16  ;;  %s17_s13 = int_to_ptr.vmem [resolvable:$true] %s16_s13 }
   0x4   :  { %p375_p1 = scmp.lt.u32.totalorder %s371_s16, %s524_s0 }
   0x6   :  { %p377_p2 = pnand %p375_p1, %p372_p0 }
   0x8   :  { %380 = shalt.err (!%p377_p2)
}
   0x9   :  { %s381_s21 = scalar_lea.vmem %s17_s13, 512  ;;  %p386_p4 = scmp.lt.s32.totalorder %s17_s13, %s17_s13 }
   0xa   :  { %p382_p3 = scmp.ne.s32.totalorder %s17_s13, %s381_s21  ;;  %p387_p5 = scmp.lt.s32.totalorder %s381_s21, %s381_s21 }
   0xc   :  { %p388_p6 = por %p387_p5, %p386_p4 }
   0xe   :  { %p389_p7 = pnand %p388_p6, %p382_p3 }
  0x10   :  { %392 = shalt.err (!%p389_p7)
}
  0x11   :  { %s444_s22 = smov 256   ;;  %s445_s23 = smov 16  }
  0x12   :  { %22 = dma.hbm_to_vmem [thread:$0]  %s524_s0, 512, %s17_s13, [#allocation3], %s444_s22, %s444_s22, %s445_s23  }
  0x13   :  { %s446_s26 = smov [#allocation5]   ;;  %s393_s30 = scalar_lea.hbm %s525_s1, 8192 }
  0x14   :  { %s28_s27 = sshll.u32 %s446_s26, 4  ;;  %p394_p8 = scmp.ne.s32.totalorder %s525_s1, %s393_s30  ;;  %s29_s27 = int_to_ptr.vmem [resolvable:$true] %s28_s27 }
  0x15   :  { %p397_p9 = scmp.lt.u32.totalorder %s393_s30, %s525_s1 }
  0x17   :  { %p399_p10 = pnand %p397_p9, %p394_p8 }
  0x19   :  { %402 = shalt.err (!%p399_p10)
}
  0x1a   :  { %s403_s8 = scalar_lea.vmem %s29_s27, 8192  ;;  %p408_p12 = scmp.lt.s32.totalorder %s29_s27, %s29_s27 }
  0x1b   :  { %p404_p11 = scmp.ne.s32.totalorder %s29_s27, %s403_s8  ;;  %p409_p13 = scmp.lt.s32.totalorder %s403_s8, %s403_s8 }
  0x1d   :  { %p410_p0 = por %p409_p13, %p408_p12 }
  0x1f   :  { %p411_p1 = pnand %p410_p0, %p404_p11 }
  0x21   :  { %414 = shalt.err (!%p411_p1)
}
  0x22   :  { %34 = dma.hbm_to_vmem [thread:$0]  %s525_s1, 8192, %s29_s27, [#allocation6], %s444_s22, %s444_s22, %s445_s23  }
  0x23   :  { %437 = dma.done.wait [#allocation3], 512  }
  0x24   :  { %438 = vsyncadd [#allocation3], 4294966784 }
  0x25   :  { %439 = dma.done.wait [#allocation6], 8192  }
  0x26   :  { %440 = vsyncadd [#allocation6], 4294959104  ;;  %v48_v0 = vld [vmem:[#allocation5 + $0x8] sm:$0xff]  ;;  %v50_v1 = vld [vmem:[#allocation5 + $0x18] sm:$0xff] }
  0x27   :  { %v47_v2 = vld [vmem:[#allocation5] sm:$0xff]  ;;  %v254_v3 = vpack.c.bf16 %v50_v1, %v48_v0  ;;  %v49_v4 = vld [vmem:[#allocation5 + $0x10] sm:$0xff]  ;;  %v52_v5 = vld [vmem:[#allocation5 + $0x28] sm:$0xff] }
  0x28   :  { %v54_v6 = vld [vmem:[#allocation5 + $0x38] sm:$0xff]  ;;  %v256_v7 = vpack.c.bf16 %v49_v4, %v47_v2  ;;  %v51_v9 = vld [vmem:[#allocation5 + $0x20] sm:$0xff]  ;;  %v53_v10 = vld [vmem:[#allocation5 + $0x30] sm:$0xff] }
  0x29   :  { %v258_v8 = vpack.c.bf16 %v54_v6, %v52_v5  ;;  %v56_v11 = vld [vmem:[#allocation5 + $0x48] sm:$0xff]  ;;  %255 = vmatprep.subr.bf16.mxu0 %v254_v3  ;;  %318 = vmatprep.subr.bf16.mxu1 %v254_v3  ;;  %v58_v12 = vld [vmem:[#allocation5 + $0x58] sm:$0xff]  ;;  %v260_v13 = vpack.c.bf16 %v53_v10, %v51_v9  ;;  %v55_v15 = vld [vmem:[#allocation5 + $0x40] sm:$0xff] }
  0x2a   :  { %257 = vmatpush1.bf16.msra.mxu0 %v256_v7  ;;  %334 = vmatpush1.bf16.msra.mxu1 %v256_v7  ;;  %v262_v14 = vpack.c.bf16 %v58_v12, %v56_v11  ;;  %v57_v16 = vld [vmem:[#allocation5 + $0x50] sm:$0xff]  ;;  %v60_v17 = vld [vmem:[#allocation5 + $0x68] sm:$0xff]  ;;  %v62_v18 = vld [vmem:[#allocation5 + $0x78] sm:$0xff] }
  0x2b   :  { %259 = vmatprep.subr.bf16.mxu0 %v258_v8  ;;  %319 = vmatprep.subr.bf16.mxu1 %v258_v8  ;;  %v264_v19 = vpack.c.bf16 %v57_v16, %v55_v15  ;;  %v266_v20 = vpack.c.bf16 %v62_v18, %v60_v17  ;;  %v59_v21 = vld [vmem:[#allocation5 + $0x60] sm:$0xff]  ;;  %v61_v22 = vld [vmem:[#allocation5 + $0x70] sm:$0xff]  ;;  %v64_v23 = vld [vmem:[#allocation5 + $0x88] sm:$0xff] }
  0x2c   :  { %v66_v24 = vld [vmem:[#allocation5 + $0x98] sm:$0xff]  ;;  %v268_v25 = vpack.c.bf16 %v61_v22, %v59_v21  ;;  %v63_v27 = vld [vmem:[#allocation5 + $0x80] sm:$0xff]  ;;  %v65_v28 = vld [vmem:[#allocation5 + $0x90] sm:$0xff] }
  0x2d   :  { %v270_v26 = vpack.c.bf16 %v66_v24, %v64_v23  ;;  %v68_v29 = vld [vmem:[#allocation5 + $0xa8] sm:$0xff]  ;;  %v70_v30 = vld [vmem:[#allocation5 + $0xb8] sm:$0xff]  ;;  %v272_v31 = vpack.c.bf16 %v65_v28, %v63_v27  ;;  %v67_v33 = vld [vmem:[#allocation5 + $0xa0] sm:$0xff] }
  0x2e   :  { %261 = vmatpush1.bf16.msra.mxu0 %v260_v13  ;;  %335 = vmatpush1.bf16.msra.mxu1 %v260_v13  ;;  %v274_v32 = vpack.c.bf16 %v70_v30, %v68_v29  ;;  %v69_v34 = vld [vmem:[#allocation5 + $0xb0] sm:$0xff]  ;;  %v72_v35 = vld [vmem:[#allocation5 + $0xc8] sm:$0xff]  ;;  %v74_v36 = vld [vmem:[#allocation5 + $0xd8] sm:$0xff] }
  0x2f   :  { %263 = vmatprep.subr.bf16.mxu0 %v262_v14  ;;  %320 = vmatprep.subr.bf16.mxu1 %v262_v14  ;;  %v276_v37 = vpack.c.bf16 %v69_v34, %v67_v33  ;;  %v71_v38 = vld [vmem:[#allocation5 + $0xc0] sm:$0xff]  ;;  %v278_v39 = vpack.c.bf16 %v74_v36, %v72_v35  ;;  %v73_v40 = vld [vmem:[#allocation5 + $0xd0] sm:$0xff]  ;;  %v498_v41 = vld [vmem:[#allocation2 + $0x8] sm:$0xff]  ;;  %v113_v36 = vlaneseq }
  0x30   :  { %v500_v42 = vld [vmem:[#allocation2 + $0x18] sm:$0xff]  ;;  %v76_v43 = vld [vmem:[#allocation5 + $0xe8] sm:$0xff]  ;;  %187 = vmatprep.mubr.f32.mxu0 %v498_v41  ;;  %v280_v45 = vpack.c.bf16 %v73_v40, %v71_v38  ;;  %v75_v47 = vld [vmem:[#allocation5 + $0xe0] sm:$0xff] }
  0x31   :  { %v78_v44 = vld [vmem:[#allocation5 + $0xf8] sm:$0xff]  ;;  %193 = vmatprep.mubr.f32.mxu1 %v500_v42  ;;  %v77_v48 = vld [vmem:[#allocation5 + $0xf0] sm:$0xff]  ;;  %v80_v49 = vld [vmem:[#allocation5 + $0x108] sm:$0xff] }
  0x32   :  { %265 = vmatpush1.bf16.msra.mxu0 %v264_v19  ;;  %336 = vmatpush1.bf16.msra.mxu1 %v264_v19  ;;  %v282_v46 = vpack.c.bf16 %v78_v44, %v76_v43  ;;  %v82_v50 = vld [vmem:[#allocation5 + $0x118] sm:$0xff]  ;;  %v284_v51 = vpack.c.bf16 %v77_v48, %v75_v47  ;;  %v79_v53 = vld [vmem:[#allocation5 + $0x100] sm:$0xff]  ;;  %v81_v54 = vld [vmem:[#allocation5 + $0x110] sm:$0xff] }
  0x33   :  { %267 = vmatprep.subr.bf16.mxu0 %v266_v20  ;;  %321 = vmatprep.subr.bf16.mxu1 %v266_v20  ;;  %v286_v52 = vpack.c.bf16 %v82_v50, %v80_v49  ;;  %v84_v55 = vld [vmem:[#allocation5 + $0x128] sm:$0xff]  ;;  %v86_v56 = vld [vmem:[#allocation5 + $0x138] sm:$0xff]  ;;  %v288_v57 = vpack.c.bf16 %v81_v54, %v79_v53  ;;  %v83_v59 = vld [vmem:[#allocation5 + $0x120] sm:$0xff] }
  0x34   :  { %v290_v58 = vpack.c.bf16 %v86_v56, %v84_v55  ;;  %v85_v60 = vld [vmem:[#allocation5 + $0x130] sm:$0xff]  ;;  %v88_v61 = vld [vmem:[#allocation5 + $0x148] sm:$0xff]  ;;  %v90_v62 = vld [vmem:[#allocation5 + $0x158] sm:$0xff] }
  0x35   :  { %v292_v63 = vpack.c.bf16 %v85_v60, %v83_v59  ;;  %v294_v0 = vpack.c.bf16 %v90_v62, %v88_v61  ;;  %v87_v1 = vld [vmem:[#allocation5 + $0x140] sm:$0xff]  ;;  %v89_v2 = vld [vmem:[#allocation5 + $0x150] sm:$0xff]  ;;  %v92_v3 = vld [vmem:[#allocation5 + $0x168] sm:$0xff] }
  0x36   :  { %269 = vmatpush1.bf16.msra.mxu0 %v268_v25  ;;  %337 = vmatpush1.bf16.msra.mxu1 %v268_v25  ;;  %v94_v4 = vld [vmem:[#allocation5 + $0x178] sm:$0xff]  ;;  %v296_v5 = vpack.c.bf16 %v89_v2, %v87_v1  ;;  %v91_v7 = vld [vmem:[#allocation5 + $0x160] sm:$0xff]  ;;  %v93_v8 = vld [vmem:[#allocation5 + $0x170] sm:$0xff] }
  0x37   :  { %271 = vmatprep.subr.bf16.mxu0 %v270_v26  ;;  %322 = vmatprep.subr.bf16.mxu1 %v270_v26  ;;  %v298_v6 = vpack.c.bf16 %v94_v4, %v92_v3  ;;  %v96_v9 = vld [vmem:[#allocation5 + $0x188] sm:$0xff]  ;;  %v98_v10 = vld [vmem:[#allocation5 + $0x198] sm:$0xff]  ;;  %v300_v11 = vpack.c.bf16 %v93_v8, %v91_v7  ;;  %v95_v13 = vld [vmem:[#allocation5 + $0x180] sm:$0xff] }
  0x38   :  { %v302_v12 = vpack.c.bf16 %v98_v10, %v96_v9  ;;  %v97_v14 = vld [vmem:[#allocation5 + $0x190] sm:$0xff]  ;;  %v100_v15 = vld [vmem:[#allocation5 + $0x1a8] sm:$0xff]  ;;  %v102_v16 = vld [vmem:[#allocation5 + $0x1b8] sm:$0xff] }
  0x39   :  { %v304_v17 = vpack.c.bf16 %v97_v14, %v95_v13  ;;  %v306_v18 = vpack.c.bf16 %v102_v16, %v100_v15  ;;  %v99_v19 = vld [vmem:[#allocation5 + $0x1a0] sm:$0xff]  ;;  %v101_v20 = vld [vmem:[#allocation5 + $0x1b0] sm:$0xff]  ;;  %v104_v21 = vld [vmem:[#allocation5 + $0x1c8] sm:$0xff] }
  0x3a   :  { %273 = vmatpush1.bf16.msra.mxu0 %v272_v31  ;;  %338 = vmatpush1.bf16.msra.mxu1 %v272_v31  ;;  %v106_v22 = vld [vmem:[#allocation5 + $0x1d8] sm:$0xff]  ;;  %v308_v23 = vpack.c.bf16 %v101_v20, %v99_v19  ;;  %v103_v25 = vld [vmem:[#allocation5 + $0x1c0] sm:$0xff]  ;;  %v105_v26 = vld [vmem:[#allocation5 + $0x1d0] sm:$0xff] }
  0x3b   :  { %275 = vmatprep.subr.bf16.mxu0 %v274_v32  ;;  %323 = vmatprep.subr.bf16.mxu1 %v274_v32  ;;  %v310_v24 = vpack.c.bf16 %v106_v22, %v104_v21  ;;  %v108_v27 = vld [vmem:[#allocation5 + $0x1e8] sm:$0xff]  ;;  %v110_v28 = vld [vmem:[#allocation5 + $0x1f8] sm:$0xff]  ;;  %v312_v29 = vpack.c.bf16 %v105_v26, %v103_v25  ;;  %v107_v31 = vld [vmem:[#allocation5 + $0x1e0] sm:$0xff] }
  0x3c   :  { %v314_v30 = vpack.c.bf16 %v110_v28, %v108_v27  ;;  %v109_v32 = vld [vmem:[#allocation5 + $0x1f0] sm:$0xff]  ;;  %v43_v34 = vld [vmem:[#allocation2] sm:$0xff] }
  0x3d   :  { %v316_v33 = vpack.c.bf16 %v109_v32, %v107_v31  ;;  %v45_v35 = vld [vmem:[#allocation2 + $0x10] sm:$0xff] }
  0x3e   :  { %277 = vmatpush1.bf16.msra.mxu0 %v276_v37  ;;  %339 = vmatpush1.bf16.msra.mxu1 %v276_v37  ;;  %v114_v37 = vshrl.u32 %v113_v36, 7 }
  0x3f   :  { %279 = vmatprep.subr.bf16.mxu0 %v278_v39  ;;  %324 = vmatprep.subr.bf16.mxu1 %v278_v39  ;;  %v111_v39 = vld [vmem:[%s526_s2] sm:$0x3]  ;;  %s447_s2 = smov [#allocation7]  }
  0x40   :  { %v115_v38 = vsub.s32 0, %v114_v37  ;;  %v119_v40 = vsub.s32 1, %v114_v37  ;;  %s237_s11 = sshll.u32 %s447_s2, 4  ;;  %s238_s11 = int_to_ptr.vmem [resolvable:$true] %s237_s11 }
  0x41   :  { %s415_s12 = scalar_lea.vmem %s238_s11, 512  ;;  %p420_p3 = scmp.lt.s32.totalorder %s238_s11, %s238_s11 }
  0x42   :  { %281 = vmatpush1.bf16.msra.mxu0 %v280_v45  ;;  %340 = vmatpush1.bf16.msra.mxu1 %v280_v45  ;;  %v116_v43 = vrot.slane %v111_v39, %v115_v38  ;;  %v120_v44 = vrot.slane %v111_v39, %v119_v40  ;;  %p416_p2 = scmp.ne.s32.totalorder %s238_s11, %s415_s12  ;;  %p421_p4 = scmp.lt.s32.totalorder %s415_s12, %s415_s12 }
  0x43   :  { %283 = vmatprep.subr.bf16.mxu0 %v282_v46  ;;  %325 = vmatprep.subr.bf16.mxu1 %v282_v46 }
  0x44   :  { %p422_p5 = por %p421_p4, %p420_p3 }
  0x46   :  { %285 = vmatpush1.bf16.msra.mxu0 %v284_v51  ;;  %341 = vmatpush1.bf16.msra.mxu1 %v284_v51  ;;  %p423_p6 = pnand %p422_p5, %p416_p2 }
  0x47   :  { %287 = vmatprep.subr.bf16.mxu0 %v286_v52  ;;  %326 = vmatprep.subr.bf16.mxu1 %v286_v52 }
  0x4a   :  { %289 = vmatpush1.bf16.msra.mxu0 %v288_v57  ;;  %342 = vmatpush1.bf16.msra.mxu1 %v288_v57 }
  0x4b   :  { %291 = vmatprep.subr.bf16.mxu0 %v290_v58  ;;  %327 = vmatprep.subr.bf16.mxu1 %v290_v58 }
  0x4e   :  { %293 = vmatpush1.bf16.msra.mxu0 %v292_v63  ;;  %343 = vmatpush1.bf16.msra.mxu1 %v292_v63 }
  0x4f   :  { %295 = vmatprep.subr.bf16.mxu0 %v294_v0  ;;  %328 = vmatprep.subr.bf16.mxu1 %v294_v0 }
  0x52   :  { %297 = vmatpush1.bf16.msra.mxu0 %v296_v5  ;;  %344 = vmatpush1.bf16.msra.mxu1 %v296_v5 }
  0x53   :  { %299 = vmatprep.subr.bf16.mxu0 %v298_v6  ;;  %329 = vmatprep.subr.bf16.mxu1 %v298_v6 }
  0x56   :  { %301 = vmatpush1.bf16.msra.mxu0 %v300_v11  ;;  %345 = vmatpush1.bf16.msra.mxu1 %v300_v11 }
  0x57   :  { %303 = vmatprep.subr.bf16.mxu0 %v302_v12  ;;  %330 = vmatprep.subr.bf16.mxu1 %v302_v12 }
  0x5a   :  { %305 = vmatpush1.bf16.msra.mxu0 %v304_v17  ;;  %346 = vmatpush1.bf16.msra.mxu1 %v304_v17 }
  0x5b   :  { %307 = vmatprep.subr.bf16.mxu0 %v306_v18  ;;  %331 = vmatprep.subr.bf16.mxu1 %v306_v18 }
  0x5e   :  { %309 = vmatpush1.bf16.msra.mxu0 %v308_v23  ;;  %347 = vmatpush1.bf16.msra.mxu1 %v308_v23 }
  0x5f   :  { %311 = vmatprep.subr.bf16.mxu0 %v310_v24  ;;  %332 = vmatprep.subr.bf16.mxu1 %v310_v24 }
  0x62   :  { %313 = vmatpush1.bf16.msra.mxu0 %v312_v29  ;;  %348 = vmatpush1.bf16.msra.mxu1 %v312_v29 }
  0x63   :  { %315 = vmatprep.subr.bf16.mxu0 %v314_v30  ;;  %333 = vmatprep.subr.bf16.mxu1 %v314_v30 }
  0x66   :  { %317 = vmatpush1.bf16.msra.mxu0 %v316_v33  ;;  %349 = vmatpush1.bf16.msra.mxu1 %v316_v33 }
  0x69   :  { %188 = vmatmul.mubr.f32.vlgmr.msra.gmra.mrb[0].mxu0 %v43_v34  ;;  %194 = vmatmul.mubr.f32.vlgmr.msra.gmra.mrb[0].mxu1 %v45_v35 }
 0x13c   :  { %v189_v45 = vpop.f32.mrb[0].mxu0  ;;  %v195_v46 = vpop.f32.mrb[0].mxu1 }
 0x13d   :  { %v190_v47 = vadd.f32 %v189_v45, %v116_v43  ;;  %v196_v48 = vadd.f32 %v195_v46, %v116_v43  ;;  %v191_v49 = vpop.f32.mrb[1].mxu0  ;;  %v197_v50 = vpop.f32.mrb[1].mxu1 }
 0x13e   :  { %v192_v51 = vadd.f32 %v191_v49, %v120_v44  ;;  %v198_v52 = vadd.f32 %v197_v50, %v120_v44 }
 0x13f   :  { %v250_v53 = vmul.f32 -1.442695, %v190_v47  ;;  %v252_v54 = vmul.f32 -1.442695, %v196_v48 }
 0x140   :  { %v251_v55 = vmul.f32 -1.442695, %v192_v51  ;;  %v253_v56 = vmul.f32 -1.442695, %v198_v52 }
 0x141   :  { %355 = vpow2.f32 %v250_v53 }
 0x142   :  { %357 = vpow2.f32 %v252_v54 }
 0x143   :  { %359 = vpow2.f32 %v251_v55 }
 0x144   :  { %361 = vpow2.f32 %v253_v56 }
 0x14b   :  { %v356_v57 = vpop.eup %355 }
 0x14c   :  { %v358_v58 = vpop.eup %357  ;;  %v212_v59 = vadd.f32 1.0, %v356_v57 }
 0x14d   :  { %v360_v60 = vpop.eup %359  ;;  %v214_v61 = vadd.f32 1.0, %v358_v58 }
 0x14e   :  { %v362_v62 = vpop.eup %361  ;;  %363 = vrcp.f32 %v212_v59  ;;  %v213_v63 = vadd.f32 1.0, %v360_v60 }
 0x14f   :  { %365 = vrcp.f32 %v214_v61  ;;  %v215_v0 = vadd.f32 1.0, %v362_v62 }
 0x150   :  { %367 = vrcp.f32 %v213_v63 }
 0x151   :  { %369 = vrcp.f32 %v215_v0 }
 0x158   :  { %v364_v1 = vpop.eup %363 }
 0x159   :  { %v366_v2 = vpop.eup %365  ;;  %v224_v3 = vmul.f32 %v364_v1, %v43_v34 }
 0x15a   :  { %v368_v4 = vpop.eup %367  ;;  %v226_v5 = vmul.f32 %v366_v2, %v45_v35 }
 0x15b   :  { %v370_v6 = vpop.eup %369  ;;  %v225_v7 = vmul.f32 %v368_v4, %v498_v41  ;;  %228 = vst [vmem:[#allocation7] sm:$0xff] %v224_v3 }
 0x15c   :  { %v227_v8 = vmul.f32 %v370_v6, %v500_v42  ;;  %230 = vst [vmem:[#allocation7 + $0x10] sm:$0xff] %v226_v5 }
 0x15d   :  { %229 = vst [vmem:[#allocation7 + $0x8] sm:$0xff] %v225_v7 }
 0x15e   :  { %231 = vst [vmem:[#allocation7 + $0x18] sm:$0xff] %v227_v8 }
 0x15f   :  { %426 = shalt.err (!%p423_p6)
}
 0x160   :  { %s427_s15 = scalar_lea.hbm %s527_s3, 512 }
 0x161   :  { %p428_p7 = scmp.ne.s32.totalorder %s527_s3, %s427_s15  ;;  %p431_p8 = scmp.lt.u32.totalorder %s427_s15, %s527_s3 }
 0x163   :  { %p433_p9 = pnand %p431_p8, %p428_p7 }
 0x165   :  { %436 = shalt.err (!%p433_p9)
}
 0x166   :  { %243 = dma.vmem_to_hbm [thread:$0]  %s238_s11, 512, %s527_s3, [#allocation4], %s444_s22, %s444_s22, %s445_s23  }
 0x167   :  { %441 = dma.done.wait [#allocation4], 512  }
 0x168   :  { %442 = vsyncadd [#allocation4], 4294966784 }
 0x169   :  { %247 = vsyncpa [#allocation3], 1 }
 0x16a   :  { %248 = vsyncpa [#allocation6], 1 }
 0x16b   :  { %249 = vsyncpa [#allocation4], 1 }

</bundles_post_ra>
